<compile_context>
chip_gen: v6e
topology: v6e:2x2x1
jax: 0.10.0
libtpu: 0.0.40
codegen_flags: <defaults>
</compile_context>

<pallas_src>
import jax
import jax.numpy as jnp
from jax.experimental import pallas as pl
from jax.experimental.pallas import tpu as pltpu


def _chunk_bounds(dim0: int, total_bytes: int, max_chunks: int = 8):
    """Static (start, size) chunks along axis 0 for multi-DMA overlap."""
    if total_bytes < (1 << 20):
        # Tiny array: a single DMA has the least overhead.
        return ((0, dim0),)
    n_chunks = max(1, min(max_chunks, dim0))
    base = dim0 // n_chunks
    rem = dim0 % n_chunks
    bounds = []
    start = 0
    for i in range(n_chunks):
        size = base + (1 if i < rem else 0)
        if size > 0:
            bounds.append((start, size))
            start += size
    return tuple(bounds)


def _make_hbm_copy_kernel(chunks):
    """Kernel: chunked whole-array HBM -> HBM DMA (no VMEM staging)."""

    def kernel(x_hbm, o_hbm, sems):
        copies = []
        for i, (start, size) in enumerate(chunks):
            cp = pltpu.make_async_copy(
                x_hbm.at[pl.ds(start, size)],
                o_hbm.at[pl.ds(start, size)],
                sems.at[i],
            )
            cp.start()
            copies.append(cp)
        for cp in copies:
            cp.wait()

    return kernel


def base_module_forward(x):
    """BaseModule.forward: identity pass-through, 0 bytes moved.

    This is the optimal implementation of an identity op: return the input
    buffer untouched (no kernel launch, no HBM traffic).
    """
    return x


@jax.jit
def base_module_forward_materialized(x: jax.Array) -> jax.Array:
    """Identity forward that materializes a fresh output buffer.

    Implemented as a DMA-only HBM->HBM copy Pallas kernel: no VMEM staging,
    no vld/vst slots used, no padding for ragged shapes.
    """
    if x.ndim == 0 or x.size == 0:
        # Nothing worth a DMA; let XLA handle the (at most scalar) copy.
        return jnp.asarray(x)

    itemsize = jnp.dtype(x.dtype).itemsize
    chunks = _chunk_bounds(int(x.shape[0]), x.size * itemsize)

    return pl.pallas_call(
        _make_hbm_copy_kernel(chunks),
        out_shape=jax.ShapeDtypeStruct(x.shape, x.dtype),
        in_specs=[pl.BlockSpec(memory_space=pl.ANY)],
        out_specs=pl.BlockSpec(memory_space=pl.ANY),
        scratch_shapes=[pltpu.SemaphoreType.DMA((len(chunks),))],
    )(x)


if __name__ == "__main__":
    key = jax.random.PRNGKey(0)

    # Small NCHW input consistent with cvnets conventions.
    x = jax.random.normal(key, (2, 4, 16, 16), dtype=jnp.float32)

    # Zero-cost identity path (the real BaseModule forward).
    y = jax.block_until_ready(base_module_forward(x))
    assert y.shape == x.shape and y.dtype == x.dtype
    assert bool(jnp.all(y == x)), "identity forward mismatch (f32)"

    # Materialized-copy path: exercises the Pallas DMA-only kernel.
    yc = jax.block_until_ready(base_module_forward_materialized(x))
    assert yc.shape == x.shape and yc.dtype == x.dtype
    assert bool(jnp.all(yc == x)), "materialized identity mismatch (f32)"

    # Secondary check: bf16 with a ragged shape — no pad/slice round trip.
    xb = jax.random.normal(key, (3, 5, 7, 11), dtype=jnp.bfloat16)
    yb = jax.block_until_ready(base_module_forward_materialized(xb))
    assert yb.shape == xb.shape and yb.dtype == xb.dtype
    assert bool(jnp.all(yb == xb)), "materialized identity mismatch (bf16)"

    print("KERNEL_OK")
</pallas_src>

<mosaic_0001>
module attributes {stable_mosaic.version = 11 : i64} {
  func.func @kernel(%arg0: memref<2x4x16x16xf32, #tpu.memory_space<any>>, %arg1: memref<2x4x16x16xf32, #tpu.memory_space<any>>, %arg2: memref<1x!tpu.dma_semaphore, #tpu.memory_space<semaphore_mem>>) attributes {dimension_semantics = [], scalar_prefetch = 0 : i64, scratch_operands = 1 : i64, tpu.core_type = #tpu.core_type<tc>} {
    %c0_i32 = arith.constant 0 : i32
    %c0_i32_0 = arith.constant 0 : i32
    %c0_i32_1 = arith.constant 0 : i32
    %c0_i32_2 = arith.constant 0 : i32
    %c0_i32_3 = arith.constant 0 : i32
    %0 = tpu.memref_slice %arg0[%c0_i32_0, %c0_i32_1, %c0_i32_2, %c0_i32_3] : memref<2x4x16x16xf32, #tpu.memory_space<any>> -> memref<2x4x16x16xf32, #tpu.memory_space<any>>
    %c0_i32_4 = arith.constant 0 : i32
    %c0_i32_5 = arith.constant 0 : i32
    %c0_i32_6 = arith.constant 0 : i32
    %c0_i32_7 = arith.constant 0 : i32
    %1 = tpu.memref_slice %arg1[%c0_i32_4, %c0_i32_5, %c0_i32_6, %c0_i32_7] : memref<2x4x16x16xf32, #tpu.memory_space<any>> -> memref<2x4x16x16xf32, #tpu.memory_space<any>>
    %2 = tpu.memref_slice %arg2[%c0_i32] : memref<1x!tpu.dma_semaphore, #tpu.memory_space<semaphore_mem>> -> memref<1x!tpu.dma_semaphore, #tpu.memory_space<semaphore_mem>>
    %3 = tpu.memref_squeeze %2 : memref<1x!tpu.dma_semaphore, #tpu.memory_space<semaphore_mem>> -> memref<!tpu.dma_semaphore, #tpu.memory_space<semaphore_mem>>
    tpu.enqueue_dma source(%0 : memref<2x4x16x16xf32, #tpu.memory_space<any>>) target(%1 : memref<2x4x16x16xf32, #tpu.memory_space<any>>) target_semaphore(%3 : memref<!tpu.dma_semaphore, #tpu.memory_space<semaphore_mem>>)
    %c0_i32_8 = arith.constant 0 : i32
    %c0_i32_9 = arith.constant 0 : i32
    %c0_i32_10 = arith.constant 0 : i32
    %c0_i32_11 = arith.constant 0 : i32
    %c0_i32_12 = arith.constant 0 : i32
    %4 = tpu.memref_slice %arg0[%c0_i32_9, %c0_i32_10, %c0_i32_11, %c0_i32_12] : memref<2x4x16x16xf32, #tpu.memory_space<any>> -> memref<2x4x16x16xf32, #tpu.memory_space<any>>
    %c0_i32_13 = arith.constant 0 : i32
    %c0_i32_14 = arith.constant 0 : i32
    %c0_i32_15 = arith.constant 0 : i32
    %c0_i32_16 = arith.constant 0 : i32
    %5 = tpu.memref_slice %arg1[%c0_i32_13, %c0_i32_14, %c0_i32_15, %c0_i32_16] : memref<2x4x16x16xf32, #tpu.memory_space<any>> -> memref<2x4x16x16xf32, #tpu.memory_space<any>>
    %6 = tpu.memref_slice %arg2[%c0_i32_8] : memref<1x!tpu.dma_semaphore, #tpu.memory_space<semaphore_mem>> -> memref<1x!tpu.dma_semaphore, #tpu.memory_space<semaphore_mem>>
    %7 = tpu.memref_squeeze %6 : memref<1x!tpu.dma_semaphore, #tpu.memory_space<semaphore_mem>> -> memref<!tpu.dma_semaphore, #tpu.memory_space<semaphore_mem>>
    tpu.wait_dma2 semaphore(%7 : memref<!tpu.dma_semaphore, #tpu.memory_space<semaphore_mem>>) src(%4 : memref<2x4x16x16xf32, #tpu.memory_space<any>>) dst(%5 : memref<2x4x16x16xf32, #tpu.memory_space<any>>)
    return
  }
}

</mosaic_0001>

<bundles_post_ra>
// kernel: base_module_forward_materialized.1
= control target key start
LH: loop header
LB: loop body
LE: loop exit
PB: predicated region body
PF: predicated region fallthrough
CT: control target
= control target key end

     0   :  { %s30_s6 = smov [#allocation2]   ;;  %s31_s7 = smov 131072   ;;  %s49_s0 = inlined_call_operand.hbm [shape: f32[2,4,16,16], index: 0, kind: input, shape index: {}]   ;;  %s50_s1 = inlined_call_operand.hbm [shape: f32[2,4,16,16], index: 1, kind: output, shape index: {}]  }
   0x1   :  { %s32_s8 = smov 0  }
   0x2   :  { %12 = dma.general %s49_s0, 2048, %s50_s1, %s30_s6, %s31_s7, [#allocation4], %s32_s8, 0  }
   0x3   :  { %28 = dma.done.wait [#allocation2], 2048 }
   0x4   :  { %29 = vsyncadd [#allocation2], 4294965248 }
   0x5   :  { %18 = vsyncmov [#allocation2] }
   0x8   :  { %s19_s13 = vpop.sfrf %18 }
   0x9   :  { %p24_p0 = scmp.ne.s32.totalorder %s19_s13, 0 }
   0xb   :  { %23 = shalt.err (%p24_p0)  }

</bundles_post_ra>
